<compile_context>
chip_gen: v7x
topology: tpu7x:2x2x1
jax: 0.10.0
libtpu: 0.0.40
codegen_flags: <defaults>
</compile_context>

<pallas_src>
import functools
import math

import jax
import jax.numpy as jnp
from jax.experimental import pallas as pl
from jax.experimental.pallas import tpu as pltpu


def _round_up(v: int, m: int) -> int:
    return (v + m - 1) // m * m


def _sinusoidal_kernel(x_ref, freq_ref, out_ref, *, k: int, half: int):
    # x_ref:    (TB, k)       f32  -- k batch scalars packed per row
    # freq_ref: (1, half)     f32  -- precomputed frequency table
    # out_ref:  (TB, k * dim)      -- packed embeddings, [sin|cos] per element
    freq = freq_ref[...]                                    # (1, half)

    if k == 1 and half % 128 == 0:
        # Lane-aligned halves: two direct, unmasked stores (no concat temp).
        arg = x_ref[...] * freq                             # (TB, half) f32
        out_ref[:, :half] = jnp.sin(arg).astype(out_ref.dtype)
        out_ref[:, half:] = jnp.cos(arg).astype(out_ref.dtype)
    else:
        # Assemble one lane-dense row and do a single dense store.
        # sin/cos are evaluated only on the (TB, half) arg per batch element,
        # i.e. the minimal EUP work; assembly shuffles run on the idle XLU.
        pieces = []
        for j in range(k):
            arg = x_ref[:, j:j + 1] * freq                  # (TB, half) f32
            pieces.append(jnp.sin(arg))
            pieces.append(jnp.cos(arg))
        out_ref[...] = jnp.concatenate(pieces, axis=-1).astype(out_ref.dtype)


def sinusoidal_pos_emb(x: jax.Array, dim: int, *, out_dtype=jnp.float32) -> jax.Array:
    """x: (B,) float array -> (B, dim) embedding (sin | cos)."""
    assert dim % 2 == 0, "dim must be even"
    assert dim >= 4, "dim must be >= 4 (dim == 2 divides by zero, as in PyTorch)"
    half = dim // 2
    b = x.shape[0]

    # Hoisted frequency table (trace-time, tiny), passed in as a VMEM input.
    scale = math.log(10000.0) / (half - 1)
    freqs = jnp.exp(jnp.arange(half, dtype=jnp.float32) * (-scale)).reshape(1, half)

    # Lane packing: for dim < 128 pack k batch rows per output row so the
    # output block's last dim is a multiple of 128 (unmasked stores).
    k = 128 // math.gcd(dim, 128) if dim < 128 else 1
    row_width = k * dim

    # Row tiling over the (packed) batch. Keep each output buffer <= ~2 MiB so
    # double-buffered in/out stays well under the 32 MiB scoped-VMEM default.
    rows = _round_up(b, k) // k
    tb = max(8, min(512, (2 * 1024 * 1024) // (row_width * 4) // 8 * 8))
    tb = min(tb, _round_up(rows, 8))
    rows_pad = _round_up(rows, tb)
    b_pad = rows_pad * k

    xf = x.astype(jnp.float32)
    if b_pad != b:
        xf = jnp.pad(xf, (0, b_pad - b))
    x2d = xf.reshape(rows_pad, k)

    kernel = functools.partial(_sinusoidal_kernel, k=k, half=half)
    out_packed = pl.pallas_call(
        kernel,
        out_shape=jax.ShapeDtypeStruct((rows_pad, row_width), out_dtype),
        grid=(rows_pad // tb,),
        in_specs=[
            pl.BlockSpec((tb, k), lambda i: (i, 0)),
            pl.BlockSpec((1, half), lambda i: (0, 0)),
        ],
        out_specs=pl.BlockSpec((tb, row_width), lambda i: (i, 0)),
        compiler_params=pltpu.CompilerParams(
            dimension_semantics=("parallel",),   # batch tiles are independent (2 TCs on v7x)
        ),
    )(x2d, freqs)

    out = out_packed.reshape(rows_pad * k, dim)
    return out[:b] if b_pad != b else out


def _reference(x: jax.Array, dim: int) -> jax.Array:
    half = dim // 2
    scale = math.log(10000.0) / (half - 1)
    freqs = jnp.exp(jnp.arange(half, dtype=jnp.float32) * (-scale))
    arg = x.astype(jnp.float32)[:, None] * freqs[None, :]
    return jnp.concatenate([jnp.sin(arg), jnp.cos(arg)], axis=-1)


if __name__ == "__main__":
    # Case 1: small dim (< 128) -> lane-packed path (k = 4, 128-lane output rows).
    B1, D1 = 8, 32
    x1 = jax.random.uniform(jax.random.PRNGKey(0), (B1,), dtype=jnp.float32,
                            minval=0.0, maxval=1000.0)
    out1 = jax.block_until_ready(sinusoidal_pos_emb(x1, D1))
    ref1 = _reference(x1, D1)
    assert out1.shape == (B1, D1)
    assert jnp.allclose(out1, ref1, atol=1e-5, rtol=1e-5), "mismatch vs reference (dim=32)"

    # Case 2: 128-aligned halves -> direct unmasked half-store path (k = 1).
    B2, D2 = 16, 256
    x2 = jax.random.uniform(jax.random.PRNGKey(1), (B2,), dtype=jnp.float32,
                            minval=0.0, maxval=1000.0)
    out2 = jax.block_until_ready(sinusoidal_pos_emb(x2, D2))
    ref2 = _reference(x2, D2)
    assert out2.shape == (B2, D2)
    assert jnp.allclose(out2, ref2, atol=1e-5, rtol=1e-5), "mismatch vs reference (dim=256)"

    print("KERNEL_OK")
</pallas_src>

<mosaic_0001>
module attributes {stable_mosaic.version = 11 : i64} {
  func.func @_sinusoidal_kernel(%arg0: i32, %arg1: memref<8x4xf32, #tpu.memory_space<vmem>>, %arg2: memref<1x16xf32, #tpu.memory_space<vmem>>, %arg3: memref<8x128xf32, #tpu.memory_space<vmem>>) attributes {dimension_semantics = [#tpu.dimension_semantics<parallel>], iteration_bounds = array<i64: 1>, scalar_prefetch = 0 : i64, scratch_operands = 0 : i64, tpu.core_type = #tpu.core_type<tc>, window_params = [{transform_indices = @transform_0, window_bounds = array<i64: 8, 4>}, {pipeline_mode = #tpu.pipeline_mode<synchronous>, transform_indices = @transform_1, window_bounds = array<i64: 1, 16>}, {transform_indices = @transform_2, window_bounds = array<i64: 8, 128>}]} {
    %c0 = arith.constant 0 : index
    %c0_0 = arith.constant 0 : index
    %0 = vector.load %arg2[%c0, %c0_0] : memref<1x16xf32, #tpu.memory_space<vmem>>, vector<1x16xf32>
    %c0_1 = arith.constant 0 : index
    %c0_2 = arith.constant 0 : index
    %1 = vector.load %arg1[%c0_1, %c0_2] : memref<8x4xf32, #tpu.memory_space<vmem>>, vector<8x1xf32>
    %2 = vector.broadcast %1 : vector<8x1xf32> to vector<8x16xf32>
    %3 = vector.broadcast %0 : vector<1x16xf32> to vector<8x16xf32>
    %4 = arith.mulf %2, %3 : vector<8x16xf32>
    %5 = math.sin %4 : vector<8x16xf32>
    %6 = math.cos %4 : vector<8x16xf32>
    %c0_3 = arith.constant 0 : index
    %c1 = arith.constant 1 : index
    %7 = vector.load %arg1[%c0_3, %c1] : memref<8x4xf32, #tpu.memory_space<vmem>>, vector<8x1xf32>
    %8 = vector.broadcast %7 : vector<8x1xf32> to vector<8x16xf32>
    %9 = vector.broadcast %0 : vector<1x16xf32> to vector<8x16xf32>
    %10 = arith.mulf %8, %9 : vector<8x16xf32>
    %11 = math.sin %10 : vector<8x16xf32>
    %12 = math.cos %10 : vector<8x16xf32>
    %c0_4 = arith.constant 0 : index
    %c2 = arith.constant 2 : index
    %13 = vector.load %arg1[%c0_4, %c2] : memref<8x4xf32, #tpu.memory_space<vmem>>, vector<8x1xf32>
    %14 = vector.broadcast %13 : vector<8x1xf32> to vector<8x16xf32>
    %15 = vector.broadcast %0 : vector<1x16xf32> to vector<8x16xf32>
    %16 = arith.mulf %14, %15 : vector<8x16xf32>
    %17 = math.sin %16 : vector<8x16xf32>
    %18 = math.cos %16 : vector<8x16xf32>
    %c0_5 = arith.constant 0 : index
    %c3 = arith.constant 3 : index
    %19 = vector.load %arg1[%c0_5, %c3] : memref<8x4xf32, #tpu.memory_space<vmem>>, vector<8x1xf32>
    %20 = vector.broadcast %19 : vector<8x1xf32> to vector<8x16xf32>
    %21 = vector.broadcast %0 : vector<1x16xf32> to vector<8x16xf32>
    %22 = arith.mulf %20, %21 : vector<8x16xf32>
    %23 = math.sin %22 : vector<8x16xf32>
    %24 = math.cos %22 : vector<8x16xf32>
    %25 = tpu.concatenate %5, %6, %11, %12, %17, %18, %23, %24 in 1 : vector<8x16xf32>, vector<8x16xf32>, vector<8x16xf32>, vector<8x16xf32>, vector<8x16xf32>, vector<8x16xf32>, vector<8x16xf32>, vector<8x16xf32> -> vector<8x128xf32>
    %c0_6 = arith.constant 0 : index
    %c0_7 = arith.constant 0 : index
    %26 = vector.load %arg3[%c0_6, %c0_7] : memref<8x128xf32, #tpu.memory_space<vmem>>, vector<8x128xf32>
    tpu.vector_store %arg3[%c0_6, %c0_7], %25 {strides = array<i32>} : memref<8x128xf32, #tpu.memory_space<vmem>>, vector<8x128xf32>,
    return
  }
  func.func @transform_0(%arg0: i32) -> (i32, i32) {
    %c0_i32 = arith.constant 0 : i32
    %c0_i32_0 = arith.constant 0 : i32
    return %arg0, %c0_i32 : i32, i32
  }
  func.func @transform_1(%arg0: i32) -> (i32, i32) {
    %c0_i32 = arith.constant 0 : i32
    %c0_i32_0 = arith.constant 0 : i32
    %c0_i32_1 = arith.constant 0 : i32
    return %c0_i32, %c0_i32_0 : i32, i32
  }
  func.func @transform_2(%arg0: i32) -> (i32, i32) {
    %c0_i32 = arith.constant 0 : i32
    %c0_i32_0 = arith.constant 0 : i32
    return %arg0, %c0_i32 : i32, i32
  }
}

</mosaic_0001>

<bundles_post_ra>
// kernel: tpu_custom_call.1
= control target key start
LH: loop header
LB: loop body
LE: loop exit
PB: predicated region body
PF: predicated region fallthrough
CT: control target
= control target key end

     0   :  { %v1038_v1 = vmov 2   ;;  %v1039_v2 = vmov 0   ;;  %s1388_s0 = inlined_call_operand.vmem [shape: f32[8,4], index: 0, kind: input, shape index: {}]   ;;  %s1389_s1 = inlined_call_operand.vmem [shape: f32[1,16], index: 1, kind: input, shape index: {}]   ;;  %s1390_s2 = inlined_call_operand.hbm [shape: f32[8,128], index: 2, kind: output, shape index: {}]  }
   0x1   :  { %v13_v0 = vld [vmem:[%s1388_s0] sm:$0xff]  ;;  %995 = vset.pattern.permute.xlu1 %v1038_v1  ;;  %993 = vset.pattern.permute.xlu0 %v1039_v2 }
   0x2   :  { %446 = vperm.xlu1 %995, %v13_v0   ;;  %16 = vperm.xlu0 %993, %v13_v0  }
   0x3   :  { %7 = vsyncpa [#allocation3], 0  ;;  %v1040_v3 = vmov 3   ;;  %v1041_v4 = vmov 1   ;;  %v926_v5 = vld [vmem:[%s1389_s1] ss:$0 sm:$0xff] }
   0x4   :  { %v1042_v42 = vmov 683565275   ;;  %v1043_v44 = vmov 2475754826   ;;  %v1044_v46 = vmov 2131351028  }
   0x5   :  { %v1045_v48 = vmov 2102212464   ;;  %v1046_v50 = vmov 920167782   ;;  %v1047_v58 = vmov 1326507024  }
   0x6   :  { %996 = vset.pattern.permute.xlu1 %v1040_v3  ;;  %994 = vset.pattern.permute.xlu0 %v1041_v4  ;;  %s1048_s0 = smov 16   ;;  %s1049_s1 = smov 32  }
   0x7   :  { %658 = vperm.xlu1 %996, %v13_v0   ;;  %234 = vperm.xlu0 %994, %v13_v0   ;;  %s1050_s13 = smov 48   ;;  %s1051_s14 = smov 64  }
   0x8   :  { %s1052_s15 = smov 80   ;;  %s1053_s16 = smov 96  }
   0x9   :  { %s1054_s17 = smov 112   ;;  %s1055_s18 = smov [#allocation2]  }
   0xa   :  { %s918_s19 = sshll.u32 %s1055_s18, 4  ;;  %s919_s19 = int_to_ptr.vmem [resolvable:$true] %s918_s19 }
   0xb   :  { %997 = vset.pattern.permute.xlu0 %v1040_v3  ;;  %s1014_s20 = scalar_lea.vmem %s919_s19, 128  ;;  %p1019_p1 = scmp.lt.s32.totalorder %s919_s19, %s919_s19 }
   0xc   :  { %p1015_p0 = scmp.ne.s32.totalorder %s919_s19, %s1014_s20  ;;  %p1020_p2 = scmp.lt.s32.totalorder %s1014_s20, %s1014_s20 }
   0xe   :  { %p1021_p3 = por %p1020_p2, %p1019_p1 }
  0x10   :  { %p1022_p4 = pnand %p1021_p3, %p1015_p0 }
  0x81   :  { %v447_v6 = vpop.permute.xlu1 %446  ;;  %v17_v7 = vpop.permute.xlu0 %16 }
  0x82   :  { %v1077_v8 = vmul.f32 %v926_v5, %v447_v6  ;;  %v1079_v9 = vmul.f32 %v926_v5, %v17_v7 }
  0x84   :  { %v450_v10 = vand.u32 2147483647, %v1077_v8  ;;  %v453_v11 = vand.u32 2139095040, %v1077_v8  ;;  %v26_v12 = vand.u32 2147483647, %v1079_v9  ;;  %v29_v13 = vand.u32 2139095040, %v1079_v9 }
  0x86   :  { %v454_v14 = vshrl.u32 %v453_v11, 23  ;;  %v457_v15 = vand.u32 8388607, %v450_v10  ;;  %v33_v16 = vand.u32 8388607, %v26_v12  ;;  %v659_v17 = vpop.permute.xlu1 %658  ;;  %v30_v18 = vshrl.u32 %v29_v13, 23  ;;  %v235_v21 = vpop.permute.xlu0 %234 }
  0x87   :  { %v1089_v19 = vmul.f32 %v926_v5, %v659_v17  ;;  %v1093_v30 = vmul.f32 %v926_v5, %v235_v21 }
  0x88   :  { %v943_v20 = vadd.s32 4294967169, %v454_v14  ;;  %v458_v22 = vor.u32 8388608, %v457_v15  ;;  %v927_v23 = vadd.s32 4294967169, %v30_v18  ;;  %v34_v26 = vor.u32 8388608, %v33_v16 }
  0x89   :  { %v665_v24 = vand.u32 2139095040, %v1089_v19  ;;  %v662_v28 = vand.u32 2147483647, %v1089_v19  ;;  %v241_v40 = vand.u32 2139095040, %v1093_v30 }
  0x8a   :  { %v460_v25 = vadd.s32 1, %v943_v20  ;;  %v36_v27 = vadd.s32 1, %v927_v23  ;;  %v1095_v32 = vshll.u32 %v458_v22, 8  ;;  %v1097_v36 = vshll.u32 %v34_v26, 8 }
  0x8b   :  { %v666_v29 = vshrl.u32 %v665_v24, 23  ;;  %v1103_v39 = vand.u32 8388607, %v662_v28 }
  0x8c   :  { %vm461_vm0 = vcmp.gt.s32.totalorder %v460_v25, 0  ;;  %vm37_vm1 = vcmp.gt.s32.totalorder %v36_v27, 0 }
  0x8d   :  { %v462_v31 = vsel %vm461_vm0, %v460_v25, 0  ;;  %v38_v35 = vsel %vm37_vm1, %v36_v27, 0  ;;  %v951_v38 = vadd.s32 4294967169, %v666_v29 }
  0x8e   :  { %v463_v33 = vshrl.u32 %v462_v31, 5  ;;  %v464_v34 = vand.u32 31, %v462_v31  ;;  %v1099_v37 = vand.u32 31, %v38_v35  ;;  %v1111_v52 = vshrl.u32 %v38_v35, 5 }
  0x8f   :  { %v672_v2 = vadd.s32 1, %v951_v38 }
  0x90   :  { %v465_v41 = vsub.s32 32, %v464_v34  ;;  %v467_v43 = vshll.u32 %v1042_v42, %v464_v34  ;;  %v470_v45 = vshll.u32 %v1043_v44, %v464_v34  ;;  %v473_v47 = vshll.u32 %v1044_v46, %v464_v34 }
  0x91   :  { %v476_v49 = vshll.u32 %v1045_v48, %v464_v34  ;;  %v479_v51 = vshll.u32 %v1046_v50, %v464_v34  ;;  %vm482_vm2 = vcmp.lt.s32.totalorder %v463_v33, 1  ;;  %vm484_vm3 = vcmp.lt.s32.totalorder %v463_v33, 3 }
  0x92   :  { %v466_v53 = vshrl.u32 %v1042_v42, %v465_v41  ;;  %v468_v54 = vshrl.u32 %v1043_v44, %v465_v41  ;;  %v471_v55 = vshrl.u32 %v1044_v46, %v465_v41  ;;  %v474_v56 = vshrl.u32 %v1045_v48, %v465_v41 }
  0x93   :  { %v477_v57 = vshrl.u32 %v1046_v50, %v465_v41  ;;  %v480_v59 = vshrl.u32 %v1047_v58, %v465_v41  ;;  %vm485_vm4 = vcmp.lt.s32.totalorder %v463_v33, 4  ;;  %v41_v63 = vsub.s32 32, %v1099_v37 }
  0x94   :  { %v469_v60 = vor.u32 %v468_v54, %v467_v43  ;;  %v472_v61 = vor.u32 %v471_v55, %v470_v45  ;;  %v475_v62 = vor.u32 %v474_v56, %v473_v47  ;;  %vm483_vm5 = vcmp.lt.s32.totalorder %v463_v33, 2 }
  0x95   :  { %v478_v0 = vor.u32 %v477_v57, %v476_v49  ;;  %v481_v1 = vor.u32 %v480_v59, %v479_v51  ;;  %v43_v14 = vshll.u32 %v1042_v42, %v1099_v37  ;;  %v44_v17 = vshrl.u32 %v1043_v44, %v41_v63 }
  0x96   :  { %v486_v3 = vsel %vm482_vm2, %v466_v53, %v469_v60  ;;  %v487_v4 = vsel %vm485_vm4, %v475_v62, 2102212464  ;;  %v490_v5 = vsel %vm482_vm2, %v469_v60, %v472_v61  ;;  %v494_v6 = vsel %vm482_vm2, %v472_v61, %v475_v62 }
  0x97   :  { %v488_v7 = vsel %vm484_vm3, %v472_v61, %v487_v4  ;;  %v491_v11 = vsel %vm485_vm4, %v478_v0, 920167782  ;;  %v495_v13 = vsel %vm485_vm4, %v481_v1, 1326507024  ;;  %v46_v18 = vshll.u32 %v1043_v44, %v1099_v37 }
  0x98   :  { %v492_v15 = vsel %vm484_vm3, %v475_v62, %v491_v11  ;;  %v496_v16 = vsel %vm484_vm3, %v478_v0, %v495_v13  ;;  %v489_v20 = vsel %vm483_vm5, %v486_v3, %v488_v7  ;;  %v47_v23 = vshrl.u32 %v1044_v46, %v41_v63 }
  0x99   :  { %v493_v21 = vsel %vm483_vm5, %v490_v5, %v492_v15  ;;  %v497_v22 = vsel %vm483_vm5, %v494_v6, %v496_v16  ;;  %v45_v29 = vor.u32 %v44_v17, %v43_v14  ;;  %v49_v34 = vshll.u32 %v1044_v46, %v1099_v37 }
  0x9a   :  { %v1136_v24 = vmul.u32.u64.low %v1095_v32, %v497_v22  ;;  %v1137_v25 = vmul.u32.u64.high %v1095_v32, %v497_v22, %v1136_v24  ;;  %v1140_v26 = vmul.u32.u64.low %v1095_v32, %v493_v21  ;;  %v1141_v27 = vmul.u32.u64.high %v1095_v32, %v493_v21, %v1140_v26 }
  0x9b   :  { %v48_v31 = vor.u32 %v47_v23, %v46_v18  ;;  %v50_v35 = vshrl.u32 %v1045_v48, %v41_v63  ;;  %v42_v33 = vshrl.u32 %v1042_v42, %v41_v63  ;;  %v52_v38 = vshll.u32 %v1045_v48, %v1099_v37 }
  0x9c   :  { %v53_v41 = vshrl.u32 %v1046_v50, %v41_v63  ;;  %v56_v43 = vshrl.u32 %v1047_v58, %v41_v63  ;;  %v505_v45 = vmul.u32 %v1095_v32, %v489_v20  ;;  %v55_v49 = vshll.u32 %v1046_v50, %v1099_v37 }
  0x9d   :  { %v51_v47 = vor.u32 %v50_v35, %v49_v34  ;;  %vm58_vm6 = vcmp.lt.s32.totalorder %v1111_v52, 1  ;;  %vm507_vm7 = vc.u32 %v1137_v25, %v1140_v26  ;;  %v508_v51 = vadd.s32 1, %v1141_v27 }
  0x9e   :  { %v54_v53 = vor.u32 %v53_v41, %v52_v38  ;;  %vm59_vm8 = vcmp.lt.s32.totalorder %v1111_v52, 2  ;;  %v57_v54 = vor.u32 %v56_v43, %v55_v49  ;;  %vm60_vm9 = vcmp.lt.s32.totalorder %v1111_v52, 3 }
  0x9f   :  { %vm61_vm10 = vcmp.lt.s32.totalorder %v1111_v52, 4  ;;  %v66_v32 = vsel %vm58_vm6, %v45_v29, %v48_v31  ;;  %v509_v55 = vsel %vm507_vm7, %v508_v51, %v1141_v27  ;;  %v70_v57 = vsel %vm58_vm6, %v48_v31, %v51_v47 }
  0xa0   :  { %v63_v56 = vsel %vm61_vm10, %v51_v47, 2102212464  ;;  %v67_v37 = vsel %vm61_vm10, %v54_v53, 920167782  ;;  %v510_v59 = vadd.s32 %v509_v55, %v505_v45  ;;  %v62_v60 = vsel %vm58_vm6, %v42_v33, %v45_v29 }
  0xa1   :  { %v68_v61 = vsel %vm60_vm9, %v51_v47, %v67_v37  ;;  %v71_v62 = vsel %vm61_vm10, %v57_v54, 1326507024  ;;  %v64_v63 = vsel %vm60_vm9, %v48_v31, %v63_v56  ;;  %vm673_vm11 = vcmp.gt.s32.totalorder %v672_v2, 0 }
  0xa2   :  { %v69_v0 = vsel %vm59_vm8, %v66_v32, %v68_v61  ;;  %v72_v1 = vsel %vm60_vm9, %v54_v53, %v71_v62  ;;  %v511_v3 = vadd.s32 536870912, %v510_v59  ;;  %v674_v13 = vsel %vm673_vm11, %v672_v2, 0 }
  0xa3   :  { %v73_v4 = vsel %vm59_vm8, %v70_v57, %v72_v1  ;;  %v1168_v5 = vmul.u32.u64.low %v1097_v36, %v69_v0  ;;  %v1169_v6 = vmul.u32.u64.high %v1097_v36, %v69_v0, %v1168_v5  ;;  %v65_v15 = vsel %vm59_vm8, %v62_v60, %v64_v63 }
  0xa4   :  { %v1173_v7 = vmul.u32.u64.low %v1097_v36, %v73_v4  ;;  %v1174_v11 = vmul.u32.u64.high %v1097_v36, %v73_v4, %v1173_v7  ;;  %v1176_v14 = vshrl.u32 %v511_v3, 30  ;;  %v676_v16 = vand.u32 31, %v674_v13 }
  0xa5   :  { %v670_v17 = vor.u32 8388608, %v1103_v39  ;;  %v238_v18 = vand.u32 2147483647, %v1093_v30  ;;  %v242_v20 = vshrl.u32 %v241_v40, 23  ;;  %v84_v22 = vadd.s32 1, %v1169_v6 }
  0xa6   :  { %v513_v21 = vshll.u32 %v1176_v14, 30  ;;  %v677_v23 = vsub.s32 32, %v676_v16  ;;  %v679_v2 = vshll.u32 %v1042_v42, %v676_v16  ;;  %v81_v24 = vmul.u32 %v1097_v36, %v65_v15 }
  0xa7   :  { %vm83_vm12 = vc.u32 %v1174_v11, %v1168_v5  ;;  %v682_v52 = vshll.u32 %v1043_v44, %v676_v16  ;;  %v685_v39 = vshll.u32 %v1044_v46, %v676_v16  ;;  %v675_v29 = vshrl.u32 %v674_v13, 5 }
  0xa8   :  { %v1192_v27 = vsub.s32 %v510_v59, %v513_v21  ;;  %v85_v40 = vsel %vm83_vm12, %v84_v22, %v1169_v6  ;;  %v680_v31 = vshrl.u32 %v1043_v44, %v677_v23  ;;  %v683_v35 = vshrl.u32 %v1044_v46, %v677_v23 }
  0xa9   :  { %v86_v34 = vadd.s32 %v85_v40, %v81_v24  ;;  %v686_v33 = vshrl.u32 %v1045_v48, %v677_v23  ;;  %v688_v36 = vshll.u32 %v1045_v48, %v676_v16  ;;  %v689_v43 = vshrl.u32 %v1046_v50, %v677_v23 }
  0xaa   :  { %v516_v38 = vsub.s32 0, %v1192_v27  ;;  %v681_v41 = vor.u32 %v680_v31, %v679_v2  ;;  %v691_v45 = vshll.u32 %v1046_v50, %v676_v16  ;;  %v684_v49 = vor.u32 %v683_v35, %v682_v52 }
  0xab   :  { %v87_v47 = vadd.s32 536870912, %v86_v34  ;;  %v687_v51 = vor.u32 %v686_v33, %v685_v39  ;;  %v692_v53 = vshrl.u32 %v1047_v58, %v677_v23  ;;  %v678_v32 = vshrl.u32 %v1042_v42, %v677_v23 }
  0xac   :  { %v944_v54 = vmin.u32 %v516_v38, %v1192_v27  ;;  %v690_v55 = vor.u32 %v689_v43, %v688_v36  ;;  %vm694_vm13 = vcmp.lt.s32.totalorder %v675_v29, 1  ;;  %vm696_vm14 = vcmp.lt.s32.totalorder %v675_v29, 3 }
  0xad   :  { %v1205_v56 = vshrl.u32 %v87_v47, 30  ;;  %v693_v37 = vor.u32 %v692_v53, %v691_v45  ;;  %vm697_vm15 = vcmp.lt.s32.totalorder %v675_v29, 4  ;;  %vm695_vm0 = vcmp.lt.s32.totalorder %v675_v29, 2 }
  0xae   :  { %v699_v57 = vsel %vm697_vm15, %v687_v51, 2102212464  ;;  %v702_v59 = vsel %vm694_vm13, %v681_v41, %v684_v49  ;;  %v710_v60 = vshll.u32 %v670_v17, 8  ;;  %v703_v62 = vsel %vm697_vm15, %v690_v55, 920167782 }
  0xaf   :  { %v89_v61 = vshll.u32 %v1205_v56, 30  ;;  %v706_v63 = vsel %vm694_vm13, %v684_v49, %v687_v51  ;;  %v935_v0 = vadd.s32 4294967169, %v242_v20  ;;  %v518_v1 = vclz %v944_v54 }
  0xb0   :  { %v698_v3 = vsel %vm694_vm13, %v678_v32, %v681_v41  ;;  %v704_v4 = vsel %vm696_vm14, %v687_v51, %v703_v62  ;;  %v707_v6 = vsel %vm697_vm15, %v693_v37, 1326507024  ;;  %v700_v13 = vsel %vm696_vm14, %v684_v49, %v699_v57 }
  0xb1   :  { %v90_v7 = vsub.s32 %v86_v34, %v89_v61  ;;  %v705_v15 = vsel %vm695_vm0, %v702_v59, %v704_v4  ;;  %v708_v16 = vsel %vm696_vm14, %v690_v55, %v707_v6  ;;  %v701_v24 = vsel %vm695_vm0, %v698_v3, %v700_v13 }
  0xb2   :  { %v709_v21 = vsel %vm695_vm0, %v706_v63, %v708_v16  ;;  %v1213_v17 = vmul.u32.u64.low %v710_v60, %v705_v15  ;;  %v1214_v22 = vmul.u32.u64.high %v710_v60, %v705_v15, %v1213_v17  ;;  %v245_v52 = vand.u32 8388607, %v238_v18 }
  0xb3   :  { %v92_v23 = vsub.s32 0, %v90_v7  ;;  %v1217_v20 = vmul.u32.u64.low %v710_v60, %v709_v21  ;;  %v1218_v2 = vmul.u32.u64.high %v710_v60, %v709_v21, %v1217_v20  ;;  %v248_v39 = vadd.s32 1, %v935_v0 }
  0xb4   :  { %v945_v40 = vadd.s32 4294967294, %v518_v1  ;;  %v720_v34 = vadd.s32 1, %v1214_v22  ;;  %v717_v33 = vmul.u32 %v710_v60, %v701_v24  ;;  %v246_v41 = vor.u32 8388608, %v245_v52 }
  0xb5   :  { %v928_v31 = vmin.u32 %v92_v23, %v90_v7  ;;  %vm249_vm1 = vcmp.gt.s32.totalorder %v248_v39, 0  ;;  %vm719_vm2 = vc.u32 %v1218_v2, %v1213_v17  ;;  %v82_v47 = vadd.s32 %v1168_v5, %v1174_v11 }
  0xb6   :  { %v250_v36 = vsel %vm249_vm1, %v248_v39, 0  ;;  %v721_v38 = vsel %vm719_vm2, %v720_v34, %v1214_v22  ;;  %vm946_vm3 = vcmp.lt.s32.totalorder %v945_v40, 0  ;;  %v1233_v55 = vshll.u32 %v246_v41, 8 }
  0xb7   :  { %v94_v35 = vclz %v928_v31  ;;  %v722_v43 = vadd.s32 %v721_v38, %v717_v33  ;;  %v252_v45 = vand.u32 31, %v250_v36  ;;  %v1229_v53 = vsel %vm946_vm3, 0, %v945_v40 }
  0xb8   :  { %v1231_v32 = vshrl.u32 %v250_v36, 5  ;;  %vm28_vm5 = vcmp.lt.s32.totalorder %v1079_v9, 0  ;;  %vm27_vm11 = vcmp.le.f32.partialorder %v26_v12, 0.7853982  ;;  %vm118_vm13 = vweird.f32 %v1079_v9 }
  0xb9   :  { %v929_v29 = vadd.s32 4294967294, %v94_v35  ;;  %v723_v49 = vadd.s32 536870912, %v722_v43  ;;  %v253_v51 = vsub.s32 32, %v252_v45  ;;  %v255_v60 = vshll.u32 %v1042_v42, %v252_v45 }
  0xba   :  { %v258_v5 = vshll.u32 %v1043_v44, %v252_v45  ;;  %v261_v13 = vshll.u32 %v1044_v46, %v252_v45  ;;  %v267_v20 = vshll.u32 %v1046_v50, %v252_v45  ;;  %vm270_vm6 = vcmp.lt.s32.totalorder %v1231_v32, 1 }
  0xbb   :  { %vm930_vm4 = vcmp.lt.s32.totalorder %v929_v29, 0  ;;  %v1235_v59 = vshrl.u32 %v723_v49, 30  ;;  %v256_v62 = vshrl.u32 %v1043_v44, %v253_v51  ;;  %v259_v11 = vshrl.u32 %v1044_v46, %v253_v51 }
  0xbc   :  { %v97_v54 = vsel %vm930_vm4, 0, %v929_v29  ;;  %v262_v3 = vshrl.u32 %v1045_v48, %v253_v51  ;;  %v264_v44 = vshll.u32 %v1045_v48, %v252_v45  ;;  %v265_v23 = vshrl.u32 %v1046_v50, %v253_v51 }
  0xbd   :  { %v98_v37 = vsub.s32 32, %v97_v54  ;;  %v102_v57 = vsub.s32 4294967266, %v97_v54  ;;  %v99_v61 = vshll.u32 %v90_v7, %v97_v54  ;;  %v725_v1 = vshll.u32 %v1235_v59, 30 }
  0xbe   :  { %v257_v4 = vor.u32 %v256_v62, %v255_v60  ;;  %v260_v6 = vor.u32 %v259_v11, %v258_v5  ;;  %v112_v7 = vsub.s32 4, %v1205_v56  ;;  %v263_v22 = vor.u32 %v262_v3, %v261_v13 }
  0xbf   :  { %v100_v63 = vshrl.u32 %v82_v47, %v98_v37  ;;  %v103_v0 = vadd.s32 127, %v102_v57  ;;  %v1246_v21 = vsub.s32 %v722_v43, %v725_v1  ;;  %v268_v24 = vshrl.u32 %v1047_v58, %v253_v51 }
  0xc0   :  { %v254_v46 = vshrl.u32 %v1042_v42, %v253_v51  ;;  %v266_v31 = vor.u32 %v265_v23, %v264_v44  ;;  %vm272_vm7 = vcmp.lt.s32.totalorder %v1231_v32, 3  ;;  %vm273_vm8 = vcmp.lt.s32.totalorder %v1231_v32, 4 }
  0xc1   :  { %v101_v15 = vor.u32 %v100_v63, %v99_v61  ;;  %v104_v16 = vshll.u32 %v103_v0, 23  ;;  %v728_v39 = vsub.s32 0, %v1246_v21  ;;  %v269_v34 = vor.u32 %v268_v24, %v267_v20 }
  0xc2   :  { %v278_v50 = vsel %vm270_vm6, %v257_v4, %v260_v6  ;;  %v275_v58 = vsel %vm273_vm8, %v263_v22, 2102212464  ;;  %v279_v33 = vsel %vm273_vm8, %v266_v31, 920167782  ;;  %v282_v42 = vsel %vm270_vm6, %v260_v6, %v263_v22 }
  0xc3   :  { %v105_v52 = vor.u32 4788187, %v104_v16  ;;  %v108_v40 = vcvt.s32.f32 %v101_v15  ;;  %v952_v35 = vmin.u32 %v728_v39, %v1246_v21  ;;  %v283_v36 = vsel %vm273_vm8, %v269_v34, 1326507024 }
  0xc4   :  { %vm271_vm9 = vcmp.lt.s32.totalorder %v1231_v32, 2  ;;  %v280_v29 = vsel %vm272_vm7, %v263_v22, %v279_v33  ;;  %v274_v43 = vsel %vm270_vm6, %v254_v46, %v257_v4  ;;  %v284_v47 = vsel %vm272_vm7, %v266_v31, %v283_v36 }
  0xc5   :  { %v106_v48 = vand.u32 2147483647, %v105_v52  ;;  %v730_v41 = vclz %v952_v35  ;;  %v281_v45 = vsel %vm271_vm9, %v278_v50, %v280_v29  ;;  %v113_v49 = vsel %vm28_vm5, %v112_v7, %v1205_v56 }
  0xc6   :  { %v276_v37 = vsel %vm272_vm7, %v260_v6, %v275_v58  ;;  %v285_v57 = vsel %vm271_vm9, %v282_v42, %v284_v47  ;;  %v1283_v62 = vmul.u32.u64.low %v1233_v55, %v281_v45  ;;  %v1284_v5 = vmul.u32.u64.high %v1233_v55, %v281_v45, %v1283_v62 }
  0xc7   :  { %v109_v38 = vmul.f32 %v108_v40, %v106_v48  ;;  %v953_v54 = vadd.s32 4294967294, %v730_v41  ;;  %v1279_v60 = vmul.u32.u64.low %v1233_v55, %v285_v57  ;;  %v1280_v61 = vmul.u32.u64.high %v1233_v55, %v285_v57, %v1279_v60 }
  0xc8   :  { %v526_v11 = vsub.s32 4294967266, %v1229_v53  ;;  %v277_v63 = vsel %vm271_vm9, %v274_v43, %v276_v37  ;;  %v115_v1 = vsel %vm27_vm11, 0, %v113_v49  ;;  %v296_v4 = vadd.s32 1, %v1284_v5 }
  0xc9   :  { %v110_v51 = vxor.u32 2147483648, %v109_v38  ;;  %vm954_vm10 = vcmp.lt.s32.totalorder %v953_v54, 0  ;;  %vm295_vm12 = vc.u32 %v1280_v61, %v1283_v62  ;;  %v522_v6 = vsub.s32 32, %v1229_v53 }
  0xca   :  { %v733_v3 = vsel %vm954_vm10, 0, %v953_v54  ;;  %v527_v13 = vadd.s32 127, %v526_v11  ;;  %v293_v7 = vmul.u32 %v1233_v55, %v277_v63  ;;  %v297_v12 = vsel %vm295_vm12, %v296_v4, %v1284_v5 }
  0xcb   :  { %v111_v56 = vsel %vm28_vm5, %v110_v51, %v109_v38  ;;  %v119_v32 = vadd.s32 3, %v115_v1  ;;  %v506_v15 = vadd.s32 %v1140_v26, %v1137_v25  ;;  %v738_v16 = vsub.s32 4294967266, %v733_v3 }
  0xcc   :  { %v114_v0 = vsel %vm27_vm11, %v1079_v9, %v111_v56  ;;  %v298_v44 = vadd.s32 %v297_v12, %v293_v7  ;;  %v528_v23 = vshll.u32 %v527_v13, 23  ;;  %v734_v24 = vsub.s32 32, %v733_v3 }
  0xcd   :  { %998 = vcosq.f32 %v114_v0  ;;  %v524_v22 = vshrl.u32 %v506_v15, %v522_v6  ;;  %v120_v52 = vand.u32 3, %v119_v32  ;;  %v523_v39 = vshll.u32 %v1192_v27, %v1229_v53 }
  0xce   :  { %1000 = vsinq.f32 %v114_v0  ;;  %v299_v20 = vadd.s32 536870912, %v298_v44  ;;  %v739_v46 = vadd.s32 127, %v738_v16  ;;  %v223_v55 = vand.u32 3, %v115_v1 }
  0xcf   :  { %v718_v31 = vadd.s32 %v1213_v17, %v1218_v2  ;;  %v525_v48 = vor.u32 %v524_v22, %v523_v39  ;;  %v529_v25 = vor.u32 4788187, %v528_v23  ;;  %vm121_vm14 = vcmp.lt.s32.totalorder %v120_v52, 2 }
  0xd0   :  { %v1305_v40 = vshrl.u32 %v299_v20, 30  ;;  %vm125_vm15 = vcmp.eq.s32.totalorder %v120_v52, 2  ;;  %v740_v27 = vshll.u32 %v739_v46, 23  ;;  %vm228_vm0 = vcmp.eq.s32.totalorder %v223_v55, 2 }
  0xd1   :  { %v736_v50 = vshrl.u32 %v718_v31, %v734_v24  ;;  %vm122_vm1 = vcmp.eq.s32.totalorder %v120_v52, 0  ;;  %vm225_vm2 = vcmp.eq.s32.totalorder %v223_v55, 0  ;;  %vm224_vm3 = vcmp.lt.s32.totalorder %v223_v55, 2 }
  0xd2   :  { %v301_v26 = vshll.u32 %v1305_v40, 30  ;;  %v530_v41 = vand.u32 2147483647, %v529_v25  ;;  %v735_v29 = vshll.u32 %v1246_v21, %v733_v3  ;;  %v741_v47 = vor.u32 4788187, %v740_v27 }
  0xd3   :  { %v532_v37 = vcvt.s32.f32 %v525_v48  ;;  %v294_v3 = vadd.s32 %v1283_v62, %v1280_v61  ;;  %vm452_vm5 = vcmp.lt.s32.totalorder %v1077_v8, 0  ;;  %vm1326_vm6 = vcmp.le.f32.partialorder %v450_v10, 0.7853982 }
  0xd4   :  { %v302_v53 = vsub.s32 %v298_v44, %v301_v26  ;;  %v737_v57 = vor.u32 %v736_v50, %v735_v29  ;;  %v742_v11 = vand.u32 2147483647, %v741_v47  ;;  %vm664_vm7 = vcmp.lt.s32.totalorder %v1089_v19, 0 }
  0xd5   :  { %v533_v5 = vmul.f32 %v532_v37, %v530_v41  ;;  %v536_v61 = vsub.s32 4, %v1176_v14  ;;  %v324_v52 = vsub.s32 4, %v1305_v40  ;;  %vm1340_vm8 = vcmp.le.f32.partialorder %v662_v28, 0.7853982 }
  0xd6   :  { %v304_v2 = vsub.s32 0, %v302_v53  ;;  %v744_v56 = vcvt.s32.f32 %v737_v57  ;;  %vm240_vm9 = vcmp.lt.s32.totalorder %v1093_v30, 0  ;;  %vm239_vm10 = vcmp.le.f32.partialorder %v238_v18, 0.7853982 }
  0xd7   :  { %v999_v34 = vpop.eup %998  ;;  %v534_v63 = vxor.u32 2147483648, %v533_v5  ;;  %v537_v46 = vsel %vm452_vm5, %v536_v61, %v1176_v14  ;;  %v325_v48 = vsel %vm240_vm9, %v324_v52, %v1305_v40  ;;  %vm330_vm11 = vweird.f32 %v1093_v30 }
  0xd8   :  { %v1001_v35 = vpop.eup %1000  ;;  %v126_v58 = vxor.u32 2147483648, %v999_v34  ;;  %v936_v49 = vmin.u32 %v304_v2, %v302_v53  ;;  %v745_v1 = vmul.f32 %v744_v56, %v742_v11  ;;  %v539_v25 = vsel %vm1326_vm6, 0, %v537_v46 }
  0xd9   :  { %v123_v33 = vxor.u32 2147483648, %v1001_v35  ;;  %v535_v12 = vsel %vm452_vm5, %v534_v63, %v533_v5  ;;  %v327_v26 = vsel %vm239_vm10, 0, %v325_v48  ;;  %v543_v50 = vadd.s32 3, %v539_v25 }
  0xda   :  { %v230_v42 = vsel %vm228_vm0, %v126_v58, %v1001_v35  ;;  %v127_v17 = vsel %vm125_vm15, %v126_v58, %v1001_v35  ;;  %v306_v60 = vclz %v936_v49  ;;  %v746_v32 = vxor.u32 2147483648, %v745_v1 }
  0xdb   :  { %v227_v36 = vsel %vm225_vm2, %v999_v34, %v123_v33  ;;  %v124_v38 = vsel %vm122_vm1, %v999_v34, %v123_v33  ;;  %v538_v62 = vsel %vm1326_vm6, %v1077_v8, %v535_v12  ;;  %v748_v34 = vsub.s32 4, %v1235_v59 }
  0xdc   :  { %v231_v43 = vsel %vm224_vm3, %v227_v36, %v230_v42  ;;  %v128_v45 = vsel %vm121_vm14, %v124_v38, %v127_v17  ;;  %v937_v21 = vadd.s32 4294967294, %v306_v60  ;;  %v747_v23 = vsel %vm664_vm7, %v746_v32, %v745_v1 }
  0xdd   :  { %v232_v51 = vsel %vm118_vm13, nan, %v231_v43  ;;  %v1317_v54 = vsel %vm118_vm13, nan, %v128_v45  ;;  %1002 = vcosq.f32 %v538_v62  ;;  %v750_v55 = vsel %vm1340_vm8, %v1089_v19, %v747_v23 }
  0xde   :  { %870 = vrot.lane.b32.xlu1 %v232_v51, %s1048_s0  ;;  %vm938_vm4 = vcmp.lt.s32.totalorder %v937_v21, 0  ;;  %1004 = vsinq.f32 %v538_v62  ;;  %v749_v35 = vsel %vm664_vm7, %v748_v34, %v1235_v59  ;;  %v331_v40 = vadd.s32 3, %v327_v26 }
  0xdf   :  { %v309_v0 = vsel %vm938_vm4, 0, %v937_v21  ;;  %1006 = vcosq.f32 %v750_v55  ;;  %v751_v58 = vsel %vm1340_vm8, 0, %v749_v35  ;;  %v647_v33 = vand.u32 3, %v539_v25 }
  0xe0   :  { %v310_v4 = vsub.s32 32, %v309_v0  ;;  %v314_v9 = vsub.s32 4294967266, %v309_v0  ;;  %v311_v6 = vshll.u32 %v302_v53, %v309_v0  ;;  %1008 = vsinq.f32 %v750_v55 }
  0xe1   :  { %v544_v53 = vand.u32 3, %v543_v50  ;;  %v435_v42 = vand.u32 3, %v327_v26  ;;  %v755_v17 = vadd.s32 3, %v751_v58  ;;  %v332_v2 = vand.u32 3, %v331_v40 }
  0xe2   :  { %v312_v13 = vshrl.u32 %v294_v3, %v310_v4  ;;  %v315_v7 = vadd.s32 127, %v314_v9  ;;  %vm649_vm14 = vcmp.eq.s32.totalorder %v647_v33, 0  ;;  %vm652_vm15 = vcmp.eq.s32.totalorder %v647_v33, 2 }
  0xe3   :  { %vm546_vm12 = vcmp.eq.s32.totalorder %v544_v53, 0  ;;  %vm549_vm13 = vcmp.eq.s32.totalorder %v544_v53, 2  ;;  %vm436_vm0 = vcmp.lt.s32.totalorder %v435_v42, 2  ;;  %vm437_vm1 = vcmp.eq.s32.totalorder %v435_v42, 0 }
  0xe4   :  { %v313_v15 = vor.u32 %v312_v13, %v311_v6  ;;  %v316_v16 = vshll.u32 %v315_v7, 23  ;;  %vm440_vm2 = vcmp.eq.s32.totalorder %v435_v42, 2  ;;  %v756_v43 = vand.u32 3, %v755_v17 }
  0xe5   :  { %vm333_vm3 = vcmp.lt.s32.totalorder %v332_v2, 2  ;;  %vm334_vm4 = vcmp.eq.s32.totalorder %v332_v2, 0  ;;  %vm337_vm5 = vcmp.eq.s32.totalorder %v332_v2, 2  ;;  %v859_v21 = vand.u32 3, %v751_v58 }
  0xe6   :  { %v317_v44 = vor.u32 4788187, %v316_v16  ;;  %v320_v24 = vcvt.s32.f32 %v313_v15  ;;  %vm545_vm6 = vcmp.lt.s32.totalorder %v544_v53, 2  ;;  %vm648_vm7 = vcmp.lt.s32.totalorder %v647_v33, 2 }
  0xe7   :  { %v1003_v18 = vpop.eup %1002  ;;  %vm758_vm8 = vcmp.eq.s32.totalorder %v756_v43, 0 }
  0xe8   :  { %v318_v20 = vand.u32 2147483647, %v317_v44  ;;  %v1005_v27 = vpop.eup %1004  ;;  %v550_v36 = vxor.u32 2147483648, %v1003_v18 }
  0xe9   :  { %v1007_v38 = vpop.eup %1006  ;;  %v547_v41 = vxor.u32 2147483648, %v1005_v27 }
  0xea   :  { %v321_v39 = vmul.f32 %v320_v24, %v318_v20  ;;  %v1009_v29 = vpop.eup %1008  ;;  %v551_v49 = vsel %vm549_vm13, %v550_v36, %v1005_v27  ;;  %v654_v51 = vsel %vm652_vm15, %v550_v36, %v1005_v27  ;;  %v762_v1 = vxor.u32 2147483648, %v1007_v38 }
  0xeb   :  { %v548_v57 = vsel %vm546_vm12, %v1003_v18, %v547_v41  ;;  %v651_v11 = vsel %vm649_vm14, %v1003_v18, %v547_v41  ;;  %v759_v0 = vxor.u32 2147483648, %v1009_v29  ;;  %vm864_vm12 = vcmp.eq.s32.totalorder %v859_v21, 2 }
  0xec   :  { %v322_v31 = vxor.u32 2147483648, %v321_v39  ;;  %v552_v13 = vsel %vm545_vm6, %v548_v57, %v551_v49  ;;  %v655_v7 = vsel %vm648_vm7, %v651_v11, %v654_v51  ;;  %v866_v16 = vsel %vm864_vm12, %v762_v1, %v1009_v29 }
  0xed   :  { %v760_v12 = vsel %vm758_vm8, %v1007_v38, %v759_v0  ;;  %vm542_vm13 = vweird.f32 %v1077_v8  ;;  %vm757_vm14 = vcmp.lt.s32.totalorder %v756_v43, 2  ;;  %vm754_vm15 = vweird.f32 %v1089_v19 }
  0xee   :  { %v323_v28 = vsel %vm240_vm9, %v322_v31, %v321_v39  ;;  %vm761_vm9 = vcmp.eq.s32.totalorder %v756_v43, 2  ;;  %v553_v44 = vsel %vm542_vm13, nan, %v552_v13  ;;  %v656_v22 = vsel %vm542_vm13, nan, %v655_v7 }
  0xef   :  { %v326_v14 = vsel %vm239_vm10, %v1093_v30, %v323_v28  ;;  %vm861_vm10 = vcmp.eq.s32.totalorder %v859_v21, 0  ;;  %v763_v32 = vsel %vm761_vm9, %v762_v1, %v1009_v29  ;;  %vm909_vm6 = vcmask 916480  }
  0xf0   :  { %1010 = vcosq.f32 %v326_v14  ;;  %v863_v15 = vsel %vm861_vm10, %v1007_v38, %v759_v0  ;;  %v764_v30 = vsel %vm757_vm14, %v760_v12, %v763_v32 }
  0xf1   :  { %1012 = vsinq.f32 %v326_v14  ;;  %v765_v62 = vsel %vm754_vm15, nan, %v764_v30 }
  0xfa   :  { %v1011_v59 = vpop.eup %1010 }
  0xfb   :  { %v1013_v45 = vpop.eup %1012  ;;  %v338_v47 = vxor.u32 2147483648, %v1011_v59 }
  0xfc   :  { %v335_v37 = vxor.u32 2147483648, %v1013_v45 }
  0xfd   :  { %v339_v60 = vsel %vm337_vm5, %v338_v47, %v1013_v45  ;;  %v442_v5 = vsel %vm440_vm2, %v338_v47, %v1013_v45  ;;  %vm901_vm2 = vcmask 392192   ;;  %vm907_vm5 = vcmask 785408  }
  0xfe   :  { %v336_v56 = vsel %vm334_vm4, %v1011_v59, %v335_v37  ;;  %v439_v63 = vsel %vm437_vm1, %v1011_v59, %v335_v37  ;;  %vm899_vm1 = vcmask 261120   ;;  %vm905_vm4 = vcmask 654336  }
  0xff   :  { %v340_v3 = vsel %vm333_vm3, %v336_v56, %v339_v60  ;;  %v443_v4 = vsel %vm436_vm0, %v439_v63, %v442_v5  ;;  %vm897_vm0 = vcmask 130048   ;;  %vm903_vm3 = vcmask 523264  }
 0x100   :  { %v341_v9 = vsel %vm330_vm11, nan, %v340_v3  ;;  %v444_v6 = vsel %vm330_vm11, nan, %v443_v4  ;;  %vm860_vm11 = vcmp.lt.s32.totalorder %v859_v21, 2 }
 0x101   :  { %874 = vrot.lane.b32.xlu0 %v341_v9, %s1049_s1  ;;  %878 = vrot.lane.b32.xlu1 %v444_v6, %s1050_s13  ;;  %v867_v61 = vsel %vm860_vm11, %v863_v15, %v866_v16 }
 0x102   :  { %v868_v23 = vsel %vm754_vm15, nan, %v867_v61 }
 0x105   :  { %882 = vrot.lane.b32.xlu0 %v553_v44, %s1051_s14  ;;  %886 = vrot.lane.b32.xlu1 %v656_v22, %s1052_s15 }
 0x109   :  { %890 = vrot.lane.b32.xlu0 %v765_v62, %s1053_s16  ;;  %894 = vrot.lane.b32.xlu1 %v868_v23, %s1054_s17 }
 0x150   :  { %v871_v20 = vpop.permute.xlu1 %870 }
 0x151   :  { %v898_v8 = vsel %vm897_vm0, %v1317_v54, %v871_v20 }
 0x173   :  { %v875_v24 = vpop.permute.xlu0 %874  ;;  %v879_v52 = vpop.permute.xlu1 %878 }
 0x174   :  { %v900_v39 = vsel %vm899_vm1, %v898_v8, %v875_v24 }
 0x175   :  { %v902_v10 = vsel %vm901_vm2, %v900_v39, %v879_v52 }
 0x177   :  { %v883_v46 = vpop.permute.xlu0 %882  ;;  %v887_v55 = vpop.permute.xlu1 %886 }
 0x178   :  { %v904_v19 = vsel %vm903_vm3, %v902_v10, %v883_v46 }
 0x179   :  { %v906_v31 = vsel %vm905_vm4, %v904_v19, %v887_v55 }
 0x17b   :  { %v891_v34 = vpop.permute.xlu0 %890  ;;  %v895_v48 = vpop.permute.xlu1 %894 }
 0x17c   :  { %v908_v28 = vsel %vm907_vm5, %v906_v31, %v891_v34 }
 0x17d   :  { %v910_v54 = vsel %vm909_vm6, %v908_v28, %v895_v48 }
 0x17e   :  { %911 = vst [vmem:[#allocation2] sm:$0xff] %v910_v54 }
 0x17f   :  { %1025 = shalt.err (!%p1022_p4)
}
 0x180   :  { %s1026_s23 = scalar_lea.hbm %s1390_s2, 128 }
 0x181   :  { %p1027_p5 = scmp.ne.s32.totalorder %s1390_s2, %s1026_s23  ;;  %p1030_p6 = scmp.lt.u32.totalorder %s1026_s23, %s1390_s2 }
 0x183   :  { %p1032_p7 = pnand %p1030_p6, %p1027_p5 }
 0x185   :  { %1035 = shalt.err (!%p1032_p7)
}
 0x186   :  { %921 = dma.vmem_to_hbm [thread:$0]  %s919_s19, 128, %s1390_s2, [#allocation3]  }
 0x187   :  { %1036 = dma.done.wait [#allocation3], 128  }
 0x188   :  { %1037 = vsyncadd [#allocation3], 4294967168 }
 0x189   :  { %925 = vsyncpa [#allocation3], 1 }

</bundles_post_ra>
